<compile_context>
chip_gen: v7x
topology: tpu7x:2x2x1
jax: 0.10.0
libtpu: 0.0.40
codegen_flags: <defaults>
</compile_context>

<pallas_src>
import jax
import jax.numpy as jnp
from jax import lax
from jax.experimental import pallas as pl
from jax.experimental.pallas import tpu as pltpu

_LANES = 128
_MIN_KERNEL_ELEMS = 1024           # below this, pure JAX is cheaper than a launch
_DEFAULT_MAX_BLOCK_ROWS = 4096     # 4096*128*4B = 2 MiB per input block (f32)


def _round_up(a, b):
    return ((a + b - 1) // b) * b


def _make_cc_stats_kernel(*, hc, strip, n_strips, cps, n_elems, needs_mask):
    """Build the per-chunk statistics kernel (all tiling params are static)."""

    def kernel(shift_ref, x_ref, y_ref, out_ref):
        r = pl.program_id(2)

        @pl.when(r == 0)
        def _init():
            out_ref[...] = jnp.zeros_like(out_ref)

        # Per-sample shifts (loop-invariant, hoisted out of the strip loop).
        shx = shift_ref[0, 0:1, :]              # (1, 128) f32
        shy = shift_ref[0, 1:2, :]

        if needs_mask:
            p = pl.program_id(1)
            gchunk = p * cps + r                # unclamped global chunk id
            chunk_limit = n_elems - gchunk * (hc * _LANES)
            # Intra-strip element offset of each (row, lane) position.
            off = (lax.broadcasted_iota(jnp.int32, (strip, _LANES), 0) * _LANES
                   + lax.broadcasted_iota(jnp.int32, (strip, _LANES), 1))

        def body(i, carry):
            sx, sy, sxy, sxx, syy = carry
            start = i * strip
            if not isinstance(start, int):
                start = pl.multiple_of(start, strip)
            xs = x_ref[0, pl.ds(start, strip), :].astype(jnp.float32) - shx
            ys = y_ref[0, pl.ds(start, strip), :].astype(jnp.float32) - shy
            if needs_mask:
                valid = off < (chunk_limit - i * (strip * _LANES))
                xs = jnp.where(valid, xs, 0.0)
                ys = jnp.where(valid, ys, 0.0)
            return (sx + xs, sy + ys,
                    sxy + xs * ys, sxx + xs * xs, syy + ys * ys)

        init = tuple(jnp.zeros((strip, _LANES), jnp.float32) for _ in range(5))
        if n_strips <= 8:
            carry = init
            for i in range(n_strips):          # short static unroll
                carry = body(i, carry)
        else:
            carry = lax.fori_loop(0, n_strips, body, init, unroll=8)
        sx, sy, sxy, sxx, syy = carry

        stats = jnp.stack([sx, sy, sxy, sxx, syy])      # (5, strip, 128)
        out_ref[0, 0] = out_ref[0, 0] + stats

    return kernel


def _cc_loss_reference(preds, labels):
    """Pure-JAX reference mirroring the PyTorch forward (loss_type='cc')."""
    B = labels.shape[0]
    x = preds.reshape(B, -1).astype(jnp.float32)
    y = labels.reshape(B, -1).astype(jnp.float32)
    xc = x - jnp.mean(x, axis=1, keepdims=True)
    yc = y - jnp.mean(y, axis=1, keepdims=True)
    cc = jnp.sum(yc * xc, axis=1) / jnp.sqrt(
        jnp.sum(yc * yc, axis=1) * jnp.sum(xc * xc, axis=1))
    return jnp.mean(cc, axis=0, keepdims=True)


def _cc_loss(preds, labels, *, max_block_rows=_DEFAULT_MAX_BLOCK_ROWS):
    """Mean Pearson CC over the batch, shape (1,) (matches loss_type='cc')."""
    assert preds.shape == labels.shape, (preds.shape, labels.shape)
    B = preds.shape[0]
    x = preds.reshape(B, -1)
    y = labels.reshape(B, -1)
    if x.dtype.name not in ("float32", "bfloat16", "float16"):
        x = x.astype(jnp.float32)
        y = y.astype(jnp.float32)
    n_elems = x.shape[1]

    # Tiny maps: per-grid-step / launch overhead dominates -> pure JAX.
    if n_elems < _MIN_KERNEL_ELEMS:
        return _cc_loss_reference(preds, labels)

    # Per-sample shift (prefix mean) for the numerically-stable shifted
    # one-pass formula; any shift value gives the exact same mathematical CC.
    prefix = min(n_elems, 1024)
    shift_x = jnp.mean(x[:, :prefix].astype(jnp.float32), axis=1)
    shift_y = jnp.mean(y[:, :prefix].astype(jnp.float32), axis=1)
    shifts = jnp.broadcast_to(
        jnp.stack([shift_x, shift_y], axis=1)[:, :, None], (B, 2, _LANES)
    ).astype(jnp.float32)

    # Lane-dense per-sample layout (rows, 128).  Pad only when numel is not a
    # multiple of 128 (uncommon; this is the only path that copies the input).
    rows = pl.cdiv(n_elems, _LANES)
    if n_elems != rows * _LANES:
        pad = rows * _LANES - n_elems           # padded tail is masked in-kernel
        x = jnp.pad(x, ((0, 0), (0, pad)))
        y = jnp.pad(y, ((0, 0), (0, pad)))
    x3 = x.reshape(B, rows, _LANES)
    y3 = y.reshape(B, rows, _LANES)

    # Chunking: biggest block that fits comfortably in VMEM; force >= 2 chunks
    # for B == 1 so the parallel row-split axis can feed both v7x TensorCores.
    itemsize = jnp.dtype(x.dtype).itemsize
    strip = 8 * max(1, 4 // itemsize)           # sublane tile: 8 (f32) / 16 (bf16)
    rows_a = _round_up(rows, strip)
    desired = pl.cdiv(rows_a, max_block_rows)
    if B == 1 and rows_a >= 2 * strip:
        desired = max(desired, 2)
    hc = min(_round_up(pl.cdiv(rows_a, desired), strip), rows_a)
    num_chunks = pl.cdiv(rows_a, hc)
    nsplit = 2 if num_chunks >= 2 else 1
    cps = pl.cdiv(num_chunks, nsplit)
    n_strips = hc // strip
    needs_mask = (nsplit * cps * hc * _LANES) != n_elems
    needs_clamp = (nsplit * cps) != num_chunks

    if needs_clamp:
        # Overhang chunk re-reads the last valid chunk; its contribution is
        # fully masked out in-kernel (its unclamped element base >= n_elems).
        def chunk_map(b, p, r):
            return (b, jnp.minimum(p * cps + r, num_chunks - 1), 0)
    else:
        def chunk_map(b, p, r):
            return (b, p * cps + r, 0)

    kernel = _make_cc_stats_kernel(
        hc=hc, strip=strip, n_strips=n_strips, cps=cps,
        n_elems=n_elems, needs_mask=needs_mask)

    stats = pl.pallas_call(
        kernel,
        out_shape=jax.ShapeDtypeStruct((B, nsplit, 5, strip, _LANES), jnp.float32),
        grid=(B, nsplit, cps),
        in_specs=[
            pl.BlockSpec((1, 2, _LANES), lambda b, p, r: (b, 0, 0)),
            pl.BlockSpec((1, hc, _LANES), chunk_map),
            pl.BlockSpec((1, hc, _LANES), chunk_map),
        ],
        out_specs=pl.BlockSpec((1, 1, 5, strip, _LANES),
                               lambda b, p, r: (b, p, 0, 0, 0)),
        compiler_params=pltpu.CompilerParams(
            dimension_semantics=("parallel", "parallel", "arbitrary"),
            vmem_limit_bytes=32 * 1024 * 1024,
        ),
    )(shifts, x3, y3)

    # Finalize on tiny data in JAX: reduce splits/sublanes/lanes, then the
    # shifted covariance/variance combination and the batch mean.
    s = jnp.sum(stats, axis=(1, 3, 4))          # (B, 5)
    sx, sy, sxy, sxx, syy = (s[:, k] for k in range(5))
    n = jnp.float32(n_elems)
    cov = sxy - sx * sy / n                     # sum((x-mx)*(y-my))
    var_x = sxx - sx * sx / n
    var_y = syy - sy * sy / n
    # Like the PyTorch reference, constant maps (zero variance) give NaN;
    # no epsilon is added so semantics match exactly.
    cc = cov / jnp.sqrt(var_x * var_y)
    return jnp.mean(cc, axis=0, keepdims=True)  # stack(...).mean(0, keepdim=True)


def saliency_loss(preds, labels, loss_type="cc"):
    if loss_type == "cc":
        return _cc_loss(preds, labels)
    raise NotImplementedError(
        f"loss_type={loss_type!r} is not implemented in the Pallas version")


if __name__ == "__main__":
    key = jax.random.PRNGKey(0)
    ks = jax.random.split(key, 6)

    def check(name, out, ref, tol=2e-3):
        out = jax.block_until_ready(out)
        if not jnp.allclose(out, ref, rtol=tol, atol=tol):
            raise AssertionError(f"{name}: kernel={out} ref={ref}")

    # 1) f32, ragged row count (20 valid rows) -> masked single-chunk path.
    B, C, H, W = 2, 1, 40, 64
    p1 = jax.random.uniform(ks[0], (B, C, H, W), dtype=jnp.float32)
    l1 = jax.random.uniform(ks[1], (B, C, H, W), dtype=jnp.float32)
    check("f32 single-chunk", saliency_loss(p1, l1, loss_type="cc"),
          _cc_loss_reference(p1, l1))

    # 2) Same data with tiny blocks: multi-chunk accumulation + 2-way parallel
    #    row split including a clamped+masked overhang chunk.
    check("f32 multi-chunk", _cc_loss(p1, l1, max_block_rows=8),
          _cc_loss_reference(p1, l1))

    # 3) bf16 inputs fed to the kernel in native dtype (cast happens in-kernel).
    p3 = jax.random.uniform(ks[2], (2, 1, 32, 64), dtype=jnp.float32).astype(jnp.bfloat16)
    l3 = jax.random.uniform(ks[3], (2, 1, 32, 64), dtype=jnp.float32).astype(jnp.bfloat16)
    check("bf16", saliency_loss(p3, l3, loss_type="cc"), _cc_loss_reference(p3, l3))

    # 4) Tiny 16x16 map -> small-input fast path (no kernel launch).
    p4 = jax.random.uniform(ks[4], (2, 1, 16, 16), dtype=jnp.float32)
    l4 = jax.random.uniform(ks[5], (2, 1, 16, 16), dtype=jnp.float32)
    check("fast path", saliency_loss(p4, l4, loss_type="cc"),
          _cc_loss_reference(p4, l4))

    print("KERNEL_OK")
</pallas_src>

<mosaic_0001>
module attributes {stable_mosaic.version = 11 : i64} {
  func.func @kernel(%arg0: i32, %arg1: i32, %arg2: i32, %arg3: memref<1x2x128xf32, #tpu.memory_space<vmem>>, %arg4: memref<1x24x128xf32, #tpu.memory_space<vmem>>, %arg5: memref<1x24x128xf32, #tpu.memory_space<vmem>>, %arg6: memref<1x1x5x8x128xf32, #tpu.memory_space<vmem>>) attributes {dimension_semantics = [#tpu.dimension_semantics<parallel>, #tpu.dimension_semantics<parallel>, #tpu.dimension_semantics<arbitrary>], iteration_bounds = array<i64: 2, 1, 1>, scalar_prefetch = 0 : i64, scratch_operands = 0 : i64, tpu.core_type = #tpu.core_type<tc>, window_params = [{transform_indices = @transform_0, window_bounds = array<i64: 1, 2, 128>}, {transform_indices = @transform_1, window_bounds = array<i64: 1, 24, 128>}, {transform_indices = @transform_2, window_bounds = array<i64: 1, 24, 128>}, {transform_indices = @transform_3, window_bounds = array<i64: 1, 1, 5, 8, 128>}]} {
    %c0_i32 = arith.constant 0 : i32
    %0 = arith.cmpi eq, %arg2, %c0_i32 : i32
    %1 = arith.extui %0 : i1 to i32
    %c0_i32_0 = arith.constant 0 : i32
    %2 = arith.cmpi ne, %1, %c0_i32_0 : i32
    scf.if %2 {
      %cst_42 = arith.constant 0.000000e+00 : f32
      %102 = vector.broadcast %cst_42 : f32 to vector<1x1x5x8x128xf32>
      %c0_43 = arith.constant 0 : index
      %c0_44 = arith.constant 0 : index
      %c0_45 = arith.constant 0 : index
      %c0_46 = arith.constant 0 : index
      %c0_47 = arith.constant 0 : index
      %103 = vector.load %arg6[%c0_43, %c0_44, %c0_45, %c0_46, %c0_47] : memref<1x1x5x8x128xf32, #tpu.memory_space<vmem>>, vector<1x1x5x8x128xf32>
      tpu.vector_store %arg6[%c0_43, %c0_44, %c0_45, %c0_46, %c0_47], %102 {strides = array<i32>} : memref<1x1x5x8x128xf32, #tpu.memory_space<vmem>>, vector<1x1x5x8x128xf32>,
    } else {
    }
    %c0 = arith.constant 0 : index
    %c0_1 = arith.constant 0 : index
    %c0_2 = arith.constant 0 : index
    %3 = vector.load %arg3[%c0, %c0_1, %c0_2] : memref<1x2x128xf32, #tpu.memory_space<vmem>>, vector<1x1x128xf32>
    %4 = vector.shape_cast %3 : vector<1x1x128xf32> to vector<1x128xf32>
    %c0_3 = arith.constant 0 : index
    %c1 = arith.constant 1 : index
    %c0_4 = arith.constant 0 : index
    %5 = vector.load %arg3[%c0_3, %c1, %c0_4] : memref<1x2x128xf32, #tpu.memory_space<vmem>>, vector<1x1x128xf32>
    %6 = vector.shape_cast %5 : vector<1x1x128xf32> to vector<1x128xf32>
    %c1_i32 = arith.constant 1 : i32
    %7 = arith.muli %arg1, %c1_i32 : i32
    %8 = arith.addi %7, %arg2 : i32
    %c3072_i32 = arith.constant 3072 : i32
    %9 = arith.muli %8, %c3072_i32 : i32
    %c2560_i32 = arith.constant 2560 : i32
    %10 = arith.subi %c2560_i32, %9 : i32
    %11 = tpu.iota {dimensions = array<i32: 0>} : vector<8x128xi32>
    %c128_i32 = arith.constant 128 : i32
    %12 = vector.broadcast %c128_i32 : i32 to vector<8x128xi32>
    %13 = arith.muli %11, %12 : vector<8x128xi32>
    %14 = tpu.iota {dimensions = array<i32: 1>} : vector<8x128xi32>
    %15 = arith.addi %13, %14 : vector<8x128xi32>
    %cst = arith.constant 0.000000e+00 : f32
    %16 = vector.broadcast %cst : f32 to vector<8x128xf32>
    %cst_5 = arith.constant 0.000000e+00 : f32
    %17 = vector.broadcast %cst_5 : f32 to vector<8x128xf32>
    %cst_6 = arith.constant 0.000000e+00 : f32
    %18 = vector.broadcast %cst_6 : f32 to vector<8x128xf32>
    %cst_7 = arith.constant 0.000000e+00 : f32
    %19 = vector.broadcast %cst_7 : f32 to vector<8x128xf32>
    %cst_8 = arith.constant 0.000000e+00 : f32
    %20 = vector.broadcast %cst_8 : f32 to vector<8x128xf32>
    %c0_9 = arith.constant 0 : index
    %c0_10 = arith.constant 0 : index
    %c0_11 = arith.constant 0 : index
    %21 = vector.load %arg4[%c0_9, %c0_10, %c0_11] : memref<1x24x128xf32, #tpu.memory_space<vmem>>, vector<1x8x128xf32>
    %22 = vector.shape_cast %21 : vector<1x8x128xf32> to vector<8x128xf32>
    %23 = vector.broadcast %4 : vector<1x128xf32> to vector<8x128xf32>
    %24 = arith.subf %22, %23 : vector<8x128xf32>
    %c0_12 = arith.constant 0 : index
    %c0_13 = arith.constant 0 : index
    %c0_14 = arith.constant 0 : index
    %25 = vector.load %arg5[%c0_12, %c0_13, %c0_14] : memref<1x24x128xf32, #tpu.memory_space<vmem>>, vector<1x8x128xf32>
    %26 = vector.shape_cast %25 : vector<1x8x128xf32> to vector<8x128xf32>
    %27 = vector.broadcast %6 : vector<1x128xf32> to vector<8x128xf32>
    %28 = arith.subf %26, %27 : vector<8x128xf32>
    %c0_i32_15 = arith.constant 0 : i32
    %29 = arith.subi %10, %c0_i32_15 : i32
    %30 = vector.broadcast %29 : i32 to vector<8x128xi32>
    %31 = arith.cmpi slt, %15, %30 : vector<8x128xi32>
    %cst_16 = arith.constant 0.000000e+00 : f32
    %32 = vector.broadcast %cst_16 : f32 to vector<8x128xf32>
    %33 = arith.select %31, %24, %32 : vector<8x128xi1>, vector<8x128xf32>
    %cst_17 = arith.constant 0.000000e+00 : f32
    %34 = vector.broadcast %cst_17 : f32 to vector<8x128xf32>
    %35 = arith.select %31, %28, %34 : vector<8x128xi1>, vector<8x128xf32>
    %36 = arith.addf %16, %33 : vector<8x128xf32>
    %37 = arith.addf %17, %35 : vector<8x128xf32>
    %38 = arith.mulf %33, %35 : vector<8x128xf32>
    %39 = arith.addf %18, %38 : vector<8x128xf32>
    %40 = arith.mulf %33, %33 : vector<8x128xf32>
    %41 = arith.addf %19, %40 : vector<8x128xf32>
    %42 = arith.mulf %35, %35 : vector<8x128xf32>
    %43 = arith.addf %20, %42 : vector<8x128xf32>
    %c0_18 = arith.constant 0 : index
    %c8 = arith.constant 8 : index
    %c0_19 = arith.constant 0 : index
    %44 = vector.load %arg4[%c0_18, %c8, %c0_19] : memref<1x24x128xf32, #tpu.memory_space<vmem>>, vector<1x8x128xf32>
    %45 = vector.shape_cast %44 : vector<1x8x128xf32> to vector<8x128xf32>
    %46 = vector.broadcast %4 : vector<1x128xf32> to vector<8x128xf32>
    %47 = arith.subf %45, %46 : vector<8x128xf32>
    %c0_20 = arith.constant 0 : index
    %c8_21 = arith.constant 8 : index
    %c0_22 = arith.constant 0 : index
    %48 = vector.load %arg5[%c0_20, %c8_21, %c0_22] : memref<1x24x128xf32, #tpu.memory_space<vmem>>, vector<1x8x128xf32>
    %49 = vector.shape_cast %48 : vector<1x8x128xf32> to vector<8x128xf32>
    %50 = vector.broadcast %6 : vector<1x128xf32> to vector<8x128xf32>
    %51 = arith.subf %49, %50 : vector<8x128xf32>
    %c1024_i32 = arith.constant 1024 : i32
    %52 = arith.subi %10, %c1024_i32 : i32
    %53 = vector.broadcast %52 : i32 to vector<8x128xi32>
    %54 = arith.cmpi slt, %15, %53 : vector<8x128xi32>
    %cst_23 = arith.constant 0.000000e+00 : f32
    %55 = vector.broadcast %cst_23 : f32 to vector<8x128xf32>
    %56 = arith.select %54, %47, %55 : vector<8x128xi1>, vector<8x128xf32>
    %cst_24 = arith.constant 0.000000e+00 : f32
    %57 = vector.broadcast %cst_24 : f32 to vector<8x128xf32>
    %58 = arith.select %54, %51, %57 : vector<8x128xi1>, vector<8x128xf32>
    %59 = arith.addf %36, %56 : vector<8x128xf32>
    %60 = arith.addf %37, %58 : vector<8x128xf32>
    %61 = arith.mulf %56, %58 : vector<8x128xf32>
    %62 = arith.addf %39, %61 : vector<8x128xf32>
    %63 = arith.mulf %56, %56 : vector<8x128xf32>
    %64 = arith.addf %41, %63 : vector<8x128xf32>
    %65 = arith.mulf %58, %58 : vector<8x128xf32>
    %66 = arith.addf %43, %65 : vector<8x128xf32>
    %c0_25 = arith.constant 0 : index
    %c16 = arith.constant 16 : index
    %c0_26 = arith.constant 0 : index
    %67 = vector.load %arg4[%c0_25, %c16, %c0_26] : memref<1x24x128xf32, #tpu.memory_space<vmem>>, vector<1x8x128xf32>
    %68 = vector.shape_cast %67 : vector<1x8x128xf32> to vector<8x128xf32>
    %69 = vector.broadcast %4 : vector<1x128xf32> to vector<8x128xf32>
    %70 = arith.subf %68, %69 : vector<8x128xf32>
    %c0_27 = arith.constant 0 : index
    %c16_28 = arith.constant 16 : index
    %c0_29 = arith.constant 0 : index
    %71 = vector.load %arg5[%c0_27, %c16_28, %c0_29] : memref<1x24x128xf32, #tpu.memory_space<vmem>>, vector<1x8x128xf32>
    %72 = vector.shape_cast %71 : vector<1x8x128xf32> to vector<8x128xf32>
    %73 = vector.broadcast %6 : vector<1x128xf32> to vector<8x128xf32>
    %74 = arith.subf %72, %73 : vector<8x128xf32>
    %c2048_i32 = arith.constant 2048 : i32
    %75 = arith.subi %10, %c2048_i32 : i32
    %76 = vector.broadcast %75 : i32 to vector<8x128xi32>
    %77 = arith.cmpi slt, %15, %76 : vector<8x128xi32>
    %cst_30 = arith.constant 0.000000e+00 : f32
    %78 = vector.broadcast %cst_30 : f32 to vector<8x128xf32>
    %79 = arith.select %77, %70, %78 : vector<8x128xi1>, vector<8x128xf32>
    %cst_31 = arith.constant 0.000000e+00 : f32
    %80 = vector.broadcast %cst_31 : f32 to vector<8x128xf32>
    %81 = arith.select %77, %74, %80 : vector<8x128xi1>, vector<8x128xf32>
    %82 = arith.addf %59, %79 : vector<8x128xf32>
    %83 = arith.addf %60, %81 : vector<8x128xf32>
    %84 = arith.mulf %79, %81 : vector<8x128xf32>
    %85 = arith.addf %62, %84 : vector<8x128xf32>
    %86 = arith.mulf %79, %79 : vector<8x128xf32>
    %87 = arith.addf %64, %86 : vector<8x128xf32>
    %88 = arith.mulf %81, %81 : vector<8x128xf32>
    %89 = arith.addf %66, %88 : vector<8x128xf32>
    %90 = vector.shape_cast %82 : vector<8x128xf32> to vector<1x8x128xf32>
    %91 = vector.shape_cast %83 : vector<8x128xf32> to vector<1x8x128xf32>
    %92 = vector.shape_cast %85 : vector<8x128xf32> to vector<1x8x128xf32>
    %93 = vector.shape_cast %87 : vector<8x128xf32> to vector<1x8x128xf32>
    %94 = vector.shape_cast %89 : vector<8x128xf32> to vector<1x8x128xf32>
    %95 = tpu.concatenate %90, %91, %92, %93, %94 in 0 : vector<1x8x128xf32>, vector<1x8x128xf32>, vector<1x8x128xf32>, vector<1x8x128xf32>, vector<1x8x128xf32> -> vector<5x8x128xf32>
    %c0_32 = arith.constant 0 : index
    %c0_33 = arith.constant 0 : index
    %c0_34 = arith.constant 0 : index
    %c0_35 = arith.constant 0 : index
    %c0_36 = arith.constant 0 : index
    %96 = vector.load %arg6[%c0_32, %c0_33, %c0_34, %c0_35, %c0_36] : memref<1x1x5x8x128xf32, #tpu.memory_space<vmem>>, vector<1x1x5x8x128xf32>
    %97 = vector.shape_cast %96 : vector<1x1x5x8x128xf32> to vector<5x8x128xf32>
    %98 = arith.addf %97, %95 : vector<5x8x128xf32>
    %c0_37 = arith.constant 0 : index
    %c0_38 = arith.constant 0 : index
    %c0_39 = arith.constant 0 : index
    %c0_40 = arith.constant 0 : index
    %c0_41 = arith.constant 0 : index
    %99 = vector.load %arg6[%c0_37, %c0_38, %c0_39, %c0_40, %c0_41] : memref<1x1x5x8x128xf32, #tpu.memory_space<vmem>>, vector<1x1x5x8x128xf32>
    %100 = vector.shape_cast %99 : vector<1x1x5x8x128xf32> to vector<5x8x128xf32>
    %101 = vector.shape_cast %98 : vector<5x8x128xf32> to vector<1x1x5x8x128xf32>
    tpu.vector_store %arg6[%c0_37, %c0_38, %c0_39, %c0_40, %c0_41], %101 {strides = array<i32>} : memref<1x1x5x8x128xf32, #tpu.memory_space<vmem>>, vector<1x1x5x8x128xf32>,
    return
  }
  func.func @transform_0(%arg0: i32, %arg1: i32, %arg2: i32) -> (i32, i32, i32) {
    %c0_i32 = arith.constant 0 : i32
    %c0_i32_0 = arith.constant 0 : i32
    %c0_i32_1 = arith.constant 0 : i32
    return %arg0, %c0_i32, %c0_i32_0 : i32, i32, i32
  }
  func.func @transform_1(%arg0: i32, %arg1: i32, %arg2: i32) -> (i32, i32, i32) {
    %c1_i32 = arith.constant 1 : i32
    %0 = arith.muli %arg1, %c1_i32 : i32
    %1 = arith.addi %0, %arg2 : i32
    %c0_i32 = arith.constant 0 : i32
    %c0_i32_0 = arith.constant 0 : i32
    return %arg0, %1, %c0_i32 : i32, i32, i32
  }
  func.func @transform_2(%arg0: i32, %arg1: i32, %arg2: i32) -> (i32, i32, i32) {
    %c1_i32 = arith.constant 1 : i32
    %0 = arith.muli %arg1, %c1_i32 : i32
    %1 = arith.addi %0, %arg2 : i32
    %c0_i32 = arith.constant 0 : i32
    %c0_i32_0 = arith.constant 0 : i32
    return %arg0, %1, %c0_i32 : i32, i32, i32
  }
  func.func @transform_3(%arg0: i32, %arg1: i32, %arg2: i32) -> (i32, i32, i32, i32, i32) {
    %c0_i32 = arith.constant 0 : i32
    %c0_i32_0 = arith.constant 0 : i32
    %c0_i32_1 = arith.constant 0 : i32
    %c0_i32_2 = arith.constant 0 : i32
    return %arg0, %arg1, %c0_i32, %c0_i32_0, %c0_i32_1 : i32, i32, i32, i32, i32
  }
}

</mosaic_0001>

<bundles_post_ra>
// kernel: tpu_custom_call.1
= control target key start
LH: loop header
LB: loop body
LE: loop exit
PB: predicated region body
PF: predicated region fallthrough
CT: control target
= control target key end

     0   :  { %8 = vsyncpa [#allocation3], 0  ;;  %s798_s0 = inlined_call_operand.vmem [shape: f32[2,2,128], index: 0, kind: input, shape index: {}]   ;;  %s799_s1 = inlined_call_operand.vmem [shape: f32[2,20,128], index: 1, kind: input, shape index: {}]   ;;  %s800_s2 = inlined_call_operand.vmem [shape: f32[2,20,128], index: 2, kind: input, shape index: {}]   ;;  %s801_s3 = inlined_call_operand.hbm [shape: f32[2,1,5,8,128], index: 3, kind: output, shape index: {}]  }
   0x1   :  { %10 = vsyncpa [#allocation3 + $0x1], 0  ;;  %s671_s12 = smov 0   ;;  %s673_s13 = smov 0  }
   0x2   :  { %s675_s14 = smov 0   ;;  %s677_s15 = smov 0  }
   0x3   :  { %s679_s16 = smov 0   ;;  %s681_s17 = smov 0  }
   0x4 LB: > { %s494_s18 = sadd.s32 4294967295, %s646_s17   ;;  %s495_s19 = sadd.s32 4294967294, %s646_s17   ;;  %s646_s17 = sphi %s681_s17, %s16_s17   ;;  %s642_s16 = sphi %s679_s16, %s808_s16   ;;  %s638_s15 = sphi %s677_s15, %s807_s15   ;;  %s634_s14 = sphi %s675_s14, %s806_s14   ;;  %s630_s13 = sphi %s673_s13, %s805_s13   ;;  %s626_s12 = sphi %s671_s12, %s804_s12  }
   0x5   : > { %s35_s20 = sadd.s32 1, %s642_s16  ;;  %s130_s21 = sadd.s32 1, %s634_s14 }
   0x6   : > { %p37_p0 = scmp.ge.s32.totalorder %s35_s20, 2  ;;  %p140_p1 = scmp.ne.s32.totalorder %s634_s14, %s630_s13 }
   0x7   : > { %p141_p2 = scmp.eq.s32.totalorder %s494_s18, 1  ;;  %p146_p3 = scmp.ne.s32.totalorder %s630_s13, %s626_s12 }
   0x8   : > { %s810_s20 = smov (%p37_p0, %s35_s20), 0  ;;  %p147_p5 = scmp.eq.s32.totalorder %s495_s19, 1 }
   0x9   : > { %p711_p4 = por %p141_p2, %p140_p1  ;;  %s125_s23 = ssub.s32 %s642_s16, %s810_s20 }
   0xa   : > { %p498_p6 = scmp.ge.s32.totalorder %s646_s17, 1  ;;  %p128_p7 = scmp.eq.s32.totalorder %s125_s23, 0 }
   0xb   : > { %p718_p8 = por %p147_p5, %p146_p3  ;;  %p202_p9 = scmp.lt.s32.totalorder %s646_s17, 3 }
   0xc   : > { %s724_s25 = scalar_select %p128_p7, %s634_s14, %s130_s21  }
   0xd   : > { %p203_p10 = pnand %p498_p6, %p202_p9 }
   0xe   : > { %p245_p11 = scmp.lt.s32.totalorder (!%p203_p10), %s638_s15, 1  ;;  %v287_v0 = vlaneseq (!%p203_p10)  ;;  %s242_s11 = sand.u32 (!%p203_p10), 1, %s630_s13  }
   0xf   : > { %206 = sbr.rel (%p203_p10) target bundleno = 55 (0x37), region = 32  ;;  %s648_s30 = smov (!%p203_p10), [#allocation2]  }
  0x10   : > { %v288_v1 = vshrl.u32 (!%p203_p10), %v287_v0, 7  ;;  %v291_v2 = vand.u32 (!%p203_p10), 127, %v287_v0  ;;  %s507_s18 = smul.u32 (!%p203_p10), 40, %s242_s11 }
  0x11   : > { %s509_s19 = smul.u32 (!%p203_p10), 640, %s638_s15 }
  0x12   : > { %v289_v3 = vmul.u32 (!%p203_p10), 128, %v288_v1  ;;  %s244_s21 = scalar_lea.vmem (!%p203_p10), [#allocation2], %s507_s18 }
  0x13   : > { %s382_s23 = sshll.u32 (!%p203_p10), %s244_s21, 4  ;;  %s748_s23 = int_to_ptr.vmem [resolvable:$true] %s382_s23 }
  0x14   : > { %v292_v5 = vadd.s32 (!%p203_p10), %v291_v2, %v289_v3  ;;  %s568_s29 = scalar_lea.vmem (!%p203_p10), %s748_s23, 640 }
  0x15   : > { %p569_p12 = scmp.ne.s32.totalorder (!%p203_p10), %s748_s23, %s568_s29 }
  0x16   : > { %s246_s26 = scalar_select %p245_p11, %s638_s15, 1  ;;  %vm306_vm0 = vcmp.lt.s32.totalorder %v292_v5, 2560  ;;  %vm323_vm1 = vcmp.lt.s32.totalorder %v292_v5, 1536  ;;  %vm340_vm2 = vcmp.lt.s32.totalorder %v292_v5, 512 }
  0x17   : > { %s752_s15 = scalar_lea.sflag [#allocation3], %s242_s11  ;;  %p570_p13 = pnand %p569_p12, %p711_p4 }
  0x18   : > { %s499_s27 = sshll.u32 %s246_s26, 1  ;;  %s508_s28 = smul.u32 24, %s246_s26 }
  0x19   : > { %s248_s4 = scalar_lea.vmem %s798_s0, %s499_s27  ;;  %p571_p0 = pneg %p570_p13 }
  0x1a   : > { %s258_s7 = scalar_lea.vmem %s799_s1, %s508_s28  ;;  %v502_v4 = vld [vmem:[%s248_s4] ss:$0 sm:$0xff]  ;;  %s270_s10 = scalar_lea.vmem %s800_s2, %s508_s28  ;;  %v503_v6 = vld [vmem:[%s248_s4 + $0x1] ss:$0 sm:$0xff] }
  0x1b   : > { %v293_v7 = vld [vmem:[%s258_s7] sm:$0xff]  ;;  %v317_v8 = vld [vmem:[%s258_s7 + $0x8] sm:$0xff]  ;;  %v334_v9 = vld [vmem:[%s258_s7 + $0x10] sm:$0xff]  ;;  %s746_s28 = scalar_lea.hbm %s801_s3, %s509_s19  ;;  %s572_s4 = sshll.u32 %s648_s30, 4  ;;  %s573_s4 = int_to_ptr.vmem [resolvable:$false] %s572_s4 }
  0x1c   : > { %v298_v10 = vsub.f32 %v293_v7, %v502_v4  ;;  %v318_v11 = vsub.f32 %v317_v8, %v502_v4  ;;  %v299_v12 = vld [vmem:[%s270_s10] sm:$0xff]  ;;  %v319_v13 = vld [vmem:[%s270_s10 + $0x8] sm:$0xff]  ;;  %v336_v14 = vld [vmem:[%s270_s10 + $0x10] sm:$0xff]  ;;  %v335_v15 = vsub.f32 %v334_v9, %v502_v4  ;;  %s574_s5 = scalar_lea.vmem %s573_s4, 1280  ;;  %p575_p1 = scmp.lt.s32.totalorder %s748_s23, %s573_s4 }
  0x1d   : > { %v304_v16 = vsub.f32 %v299_v12, %v503_v6  ;;  %v320_v17 = vsub.f32 %v319_v13, %v503_v6  ;;  %v337_v20 = vsub.f32 %v336_v14, %v503_v6  ;;  %p576_p2 = scmp.lt.s32.totalorder %s574_s5, %s568_s29 }
  0x1e   : > { %v307_v18 = vsel %vm306_vm0, %v298_v10, 0.0  ;;  %v324_v19 = vsel %vm323_vm1, %v318_v11, 0.0  ;;  %v341_v22 = vsel %vm340_vm2, %v335_v15, 0.0 }
  0x1f   : > { %v326_v21 = vadd.f32 %v324_v19, %v307_v18  ;;  %v308_v23 = vsel %vm306_vm0, %v304_v16, 0.0  ;;  %v325_v24 = vsel %vm323_vm1, %v320_v17, 0.0  ;;  %v342_v26 = vsel %vm340_vm2, %v337_v20, 0.0  ;;  %p577_p3 = por %p576_p2, %p575_p1 }
  0x20   : > { %v327_v25 = vadd.f32 %v325_v24, %v308_v23  ;;  %v311_v27 = vmul.f32 %v308_v23, %v307_v18  ;;  %v328_v28 = vmul.f32 %v325_v24, %v324_v19  ;;  %v345_v30 = vmul.f32 %v342_v26, %v341_v22 }
  0x21   : > { %v343_v29 = vadd.f32 %v341_v22, %v326_v21  ;;  %v313_v31 = vmul.f32 %v307_v18, %v307_v18  ;;  %v330_v32 = vmul.f32 %v324_v19, %v324_v19  ;;  %v347_v35 = vmul.f32 %v341_v22, %v341_v22  ;;  %p578_p5 = pnand %p577_p3, %p571_p0 }
  0x22   : > { %v344_v33 = vadd.f32 %v342_v26, %v327_v25  ;;  %v329_v34 = vadd.f32 %v328_v28, %v311_v27  ;;  %v315_v36 = vmul.f32 %v308_v23, %v308_v23  ;;  %v332_v38 = vmul.f32 %v325_v24, %v325_v24 }
  0x23   : > { %v331_v37 = vadd.f32 %v330_v32, %v313_v31  ;;  %v349_v39 = vmul.f32 %v342_v26, %v342_v26  ;;  %361 = vst [vmem:[%s244_s21] sm:$0xff] %v343_v29 }
  0x24   : > { %v346_v40 = vadd.f32 %v345_v30, %v329_v34  ;;  %v333_v42 = vadd.f32 %v332_v38, %v315_v36  ;;  %362 = vst [vmem:[%s244_s21 + $0x8] sm:$0xff] %v344_v33 }
  0x25   : > { %v348_v41 = vadd.f32 %v347_v35, %v331_v37 }
  0x26   : > { %v350_v43 = vadd.f32 %v349_v39, %v333_v42  ;;  %363 = vst [vmem:[%s244_s21 + $0x10] sm:$0xff] %v346_v40 }
  0x27   : > { %364 = vst [vmem:[%s244_s21 + $0x18] sm:$0xff] %v348_v41 }
  0x28   : > { %365 = vst [vmem:[%s244_s21 + $0x20] sm:$0xff] %v350_v43 }
  0x29   : > { %581 = shalt.err (!%p578_p5)
}
  0x2a   : > { %s582_s6 = scalar_lea.hbm %s746_s28, 640  ;;  %s586_s9 = scalar_lea.hbm %s801_s3, 1280 }
  0x2b   : > { %p583_p6 = scmp.ne.s32.totalorder %s746_s28, %s582_s6  ;;  %p587_p10 = scmp.lt.u32.totalorder %s746_s28, %s801_s3 }
  0x2c   : > { %p588_p11 = scmp.lt.u32.totalorder %s586_s9, %s582_s6  ;;  %p590_p13 = scmp.lt.u32.totalorder %s582_s6, %s746_s28 }
  0x2d   : > { %p584_p7 = pnand %p583_p6, %p711_p4 }
  0x2e   : > { %p589_p12 = por %p588_p11, %p587_p10 }
  0x2f   : > { %p585_p9 = pneg %p584_p7 }
  0x30   : > { %p591_p0 = por %p590_p13, %p589_p12 }
  0x32   : > { %p592_p1 = pnand %p591_p0, %p585_p9 }
  0x34   : > { %595 = shalt.err (!%p592_p1)
}
  0x35   : > { %s649_s18 = smov 128   ;;  %s650_s19 = smov 8  }
  0x36   : > { %510 = dma.vmem_to_hbm [thread:$0]  (%p711_p4), %s748_s23, 640, %s746_s28, %s752_s15, %s649_s18, %s649_s18, %s650_s19  }
  0x37 PF: > { %p516_p2 = scmp.ge.s32.totalorder %s646_s17, 2  ;;  %s397_s21 = sand.u32 1, %s626_s12  }
  0x38   : > { %s398_s26 = scalar_lea.sflag [#allocation3], %s397_s21 }
  0x39   : > { %p513_p3 = pnand %p516_p2, %p718_p8 }
  0x3b   : > { %621 = dma.done.wait (!%p513_p3), %s398_s26, 640  }
  0x3c   : > { %623 = vsyncadd (!%p513_p3), %s398_s26, 4294966656  ;;  %s16_s17 = sadd.s32 1, %s646_s17   ;;  %s804_s12 = smov %s630_s13 }
  0x3d   : > { %p13_p5 = scmp.ge.s32.totalorder %s16_s17, 4   ;;  %s805_s13 = smov %s634_s14 }
  0x3e   : > { %s806_s14 = smov %s724_s25  ;;  %s807_s15 = smov %s642_s16 }
  0x3f   : > { %s808_s16 = smov %s810_s20  ;;  %15 = sbr.rel (!%p13_p5) target bundleno = 4 (0x4), region = 77 }
  0x46   :  { %403 = vsyncpa [#allocation3], 1 }
  0x47   :  { %405 = vsyncpa [#allocation3 + $0x1], 1 }

</bundles_post_ra>
